<compile_context>
chip_gen: v5e
topology: v5e:2x2
jax: 0.10.0
libtpu: 0.0.40
codegen_flags: <defaults>
</compile_context>

<pallas_src>
from functools import partial

import jax
import jax.numpy as jnp
import numpy as np
from jax.experimental import pallas as pl
from jax.experimental.pallas import tpu as pltpu

N_BINS = 40


def _pick_tile(n, c, n_bins):
    """Sample-tile size: multiple of 128 (lane-dense), VMEM-budgeted."""
    n128 = pl.cdiv(max(n, 1), 128) * 128
    bins_pad = ((n_bins + 7) // 8) * 8
    # Rough per-sample VMEM bytes inside the kernel: double-buffered input
    # block + a few f32 [C, T] temps (cast / transposed / exp) + the
    # [n_bins, T] one-hot + a handful of [1, T] rows.  Budget ~10 MiB so we
    # stay comfortably inside v5e's 16 MiB scoped-VMEM default (and far below
    # v7x's 64 MiB physical per-TC VMEM).
    per_sample = 6 * 4 * c + 4 * bins_pad + 64
    by_vmem = max(128, ((10 * 1024 * 1024) // per_sample) // 128 * 128)
    tile = int(min(8192, by_vmem, n128))
    # Keep >= 2 grid steps when there is enough work so dimension_semantics
    # ("parallel",) can split tiles across v7x's two TensorCores.
    if n128 > 128 and tile >= n128:
        tile = max(128, (n128 // 2) // 128 * 128)
    return tile


def _ece_bin_kernel(logits_ref, labels_ref, out_ref, *, n_valid, n_bins, bins_pad):
    i = pl.program_id(0)

    # [T, C] tile -> lane-dense [C, T] compute layout (in-kernel transpose
    # rides the XLU; the VPU is the binding unit here).
    x = logits_ref[...].astype(jnp.float32).T      # [C, T]  classes on sublanes
    labels = labels_ref[...].astype(jnp.float32)   # [1, T]  lane-dense
    c, t = x.shape

    # softmax max-prob (confidence): 1 / sum(exp(x - max))  -> [1, T]
    m = jnp.max(x, axis=0, keepdims=True)
    denom = jnp.sum(jnp.exp(x - m), axis=0, keepdims=True)
    conf = 1.0 / denom

    # prediction = first maximal class (matches torch.max tie-breaking) -> [1, T]
    cls = jax.lax.broadcasted_iota(jnp.int32, (c, t), 0).astype(jnp.float32)
    pred = jnp.min(jnp.where(x == m, cls, float(c)), axis=0, keepdims=True)
    acc = (pred == labels).astype(jnp.float32)     # [1, T]

    # validity mask for the ragged last tile -> [1, T]
    samp = jax.lax.broadcasted_iota(jnp.int32, (1, t), 1) + i * t
    valid = samp < n_valid
    validf = valid.astype(jnp.float32)
    # where-select (not multiply): garbage tail rows can yield NaN/Inf conf and
    # 0 * NaN would poison the MXU accumulation.
    conf_m = jnp.where(valid, conf, 0.0)
    acc_m = jnp.where(valid, acc, 0.0)

    # bin index in 1..n_bins via a single ceil; (lower, upper] edge semantics.
    # conf <= 1 always (denominator >= 1), and conf_m == 0 for invalid lanes
    # -> bin_idx 0 matches no bin.
    bin_idx = jnp.ceil(conf_m * float(n_bins))     # [1, T]

    # one-hot bin membership, bins on the sublane axis -> [bins_pad, T]
    # (single compare + cast; padded rows b+1 > n_bins never match)
    b1 = jax.lax.broadcasted_iota(jnp.int32, (bins_pad, 1), 0).astype(jnp.float32) + 1.0
    in_bin = (bin_idx == b1).astype(jnp.float32)

    # stats operand S: rows = [count weight, conf, acc, 0...] -> [8, T]
    # (8 rows and 3 rows occupy the same vregs; keep the MXU-aligned M=8)
    row = jax.lax.broadcasted_iota(jnp.int32, (8, t), 0)
    s = jnp.where(row == 0, validf,
        jnp.where(row == 1, conf_m,
        jnp.where(row == 2, acc_m, 0.0)))

    # single MXU matmul, contracting the sample (lane) axis of both operands:
    #   stats[j, bin] = sum_i S[j, i] * in_bin[bin, i]        -> [8, bins_pad]
    stats = jax.lax.dot_general(
        s, in_bin,
        dimension_numbers=(((1,), (1,)), ((), ())),
        preferred_element_type=jnp.float32,
        precision=jax.lax.Precision.HIGHEST)

    out_ref[0] = stats   # one tiny (8, bins_pad) store per tile


@partial(jax.jit, static_argnames=("n_bins",))
def _ece_device(logits, labels, n_bins=N_BINS):
    n, n_classes = logits.shape
    bins_pad = ((n_bins + 7) // 8) * 8
    tile = _pick_tile(n, n_classes, n_bins)
    num_tiles = pl.cdiv(n, tile)

    # Lane-dense labels presentation: free reshape, no pad.  Logits go in
    # untouched as [N, C]; the kernel transposes its tile.
    labels_r = labels.astype(jnp.int32).reshape(1, n)

    kernel = partial(_ece_bin_kernel, n_valid=n, n_bins=n_bins, bins_pad=bins_pad)
    partials = pl.pallas_call(
        kernel,
        out_shape=jax.ShapeDtypeStruct((num_tiles, 8, bins_pad), jnp.float32),
        grid=(num_tiles,),
        in_specs=[
            pl.BlockSpec((tile, n_classes), lambda i: (i, 0)),
            pl.BlockSpec((1, tile), lambda i: (0, i)),
        ],
        out_specs=pl.BlockSpec((1, 8, bins_pad), lambda i: (i, 0, 0)),
        compiler_params=pltpu.CompilerParams(
            dimension_semantics=("parallel",),
            vmem_limit_bytes=32 * 1024 * 1024),
    )(logits, labels_r)

    stats = jnp.sum(partials, axis=0)      # [8, bins_pad]
    counts = stats[0, :n_bins]
    sum_conf = stats[1, :n_bins]
    sum_acc = stats[2, :n_bins]

    prop_in_bin = counts / n
    safe = jnp.maximum(counts, 1.0)
    ece = jnp.sum(jnp.where(counts > 0,
                            jnp.abs(sum_conf / safe - sum_acc / safe) * prop_in_bin,
                            0.0))
    return ece


def ece_loss(logits, labels, n_bins=N_BINS):
    """Pallas equivalent of ECELoss.forward: returns [0]*n_classes + [ece]."""
    logits = jnp.asarray(logits)   # native dtype goes straight into the DMA
    labels = jnp.asarray(labels)
    n_classes = int(logits.shape[1])
    ece = _ece_device(logits, labels, n_bins=n_bins)
    ece_per_class = [0 for _ in range(n_classes)]
    ece_per_class.append(float(ece))   # single host sync (torch .item() equivalent)
    return ece_per_class


def _reference_ece(logits, labels, n_bins=N_BINS):
    """Pure numpy reference mirroring the PyTorch module."""
    logits = np.asarray(logits, np.float32)
    labels = np.asarray(labels)
    ex = np.exp(logits - logits.max(axis=1, keepdims=True))
    sm = ex / ex.sum(axis=1, keepdims=True)
    conf = sm.max(axis=1)
    pred = sm.argmax(axis=1)
    acc = (pred == labels).astype(np.float32)
    bnd = np.linspace(0, 1, n_bins + 1, dtype=np.float32)
    ece = 0.0
    for lo, up in zip(bnd[:-1], bnd[1:]):
        in_bin = (conf > lo) & (conf <= up)
        prop = in_bin.mean()
        if prop > 0:
            ece += abs(conf[in_bin].mean() - acc[in_bin].mean()) * prop
    return float(ece)


if __name__ == "__main__":
    key = jax.random.PRNGKey(0)
    k1, k2, k3, k4 = jax.random.split(key, 4)

    # case 1: small batch of logits [N, C]
    N, C = 64, 16
    logits = jax.random.normal(k1, (N, C), dtype=jnp.float32) * 2.0
    labels = jax.random.randint(k2, (N,), 0, C, dtype=jnp.int32)

    result = ece_loss(logits, labels)          # list: C zeros + [ece]
    jax.block_until_ready(jnp.asarray(result[-1]))

    ref = _reference_ece(np.array(logits), np.array(labels))
    assert abs(result[-1] - ref) < 1e-5, (result[-1], ref)
    assert len(result) == C + 1
    assert all(v == 0 for v in result[:-1])

    # case 2: ragged N (exercises the unpadded last-tile mask path)
    N2, C2 = 100, 10
    logits2 = jax.random.normal(k3, (N2, C2), dtype=jnp.float32) * 3.0
    labels2 = jax.random.randint(k4, (N2,), 0, C2, dtype=jnp.int32)
    result2 = ece_loss(logits2, labels2)
    ref2 = _reference_ece(np.array(logits2), np.array(labels2))
    assert abs(result2[-1] - ref2) < 1e-5, (result2[-1], ref2)

    print("KERNEL_OK")
</pallas_src>

<mosaic_0001>
module attributes {stable_mosaic.version = 11 : i64} {
  func.func @_ece_bin_kernel(%arg0: i32, %arg1: memref<128x16xf32, #tpu.memory_space<vmem>>, %arg2: memref<1x128xi32, #tpu.memory_space<vmem>>, %arg3: memref<1x8x40xf32, #tpu.memory_space<vmem>>) attributes {dimension_semantics = [#tpu.dimension_semantics<parallel>], iteration_bounds = array<i64: 1>, scalar_prefetch = 0 : i64, scratch_operands = 0 : i64, tpu.core_type = #tpu.core_type<tc>, window_params = [{transform_indices = @transform_0, window_bounds = array<i64: 128, 16>}, {transform_indices = @transform_1, window_bounds = array<i64: 1, 128>}, {transform_indices = @transform_2, window_bounds = array<i64: 1, 8, 40>}]} {
    %c0 = arith.constant 0 : index
    %c0_0 = arith.constant 0 : index
    %0 = vector.load %arg1[%c0, %c0_0] : memref<128x16xf32, #tpu.memory_space<vmem>>, vector<128x16xf32>
    %1 = tpu.transpose %0, [1, 0] : vector<128x16xf32> -> vector<16x128xf32>
    %c0_1 = arith.constant 0 : index
    %c0_2 = arith.constant 0 : index
    %2 = vector.load %arg2[%c0_1, %c0_2] : memref<1x128xi32, #tpu.memory_space<vmem>>, vector<1x128xi32>
    %3 = arith.sitofp %2 : vector<1x128xi32> to vector<1x128xf32>
    %cst = arith.constant dense<0xFF800000> : vector<128xf32>
    %4 = vector.multi_reduction <maximumf>, %1, %cst [0] : vector<16x128xf32> to vector<128xf32>
    %5 = vector.shape_cast %4 : vector<128xf32> to vector<1x128xf32>
    %6 = vector.broadcast %5 : vector<1x128xf32> to vector<16x128xf32>
    %7 = arith.subf %1, %6 : vector<16x128xf32>
    %8 = math.exp %7 : vector<16x128xf32>
    %cst_3 = arith.constant dense<0.000000e+00> : vector<128xf32>
    %9 = vector.multi_reduction <add>, %8, %cst_3 [0] : vector<16x128xf32> to vector<128xf32>
    %10 = vector.shape_cast %9 : vector<128xf32> to vector<1x128xf32>
    %cst_4 = arith.constant 1.000000e+00 : f32
    %11 = vector.broadcast %cst_4 : f32 to vector<1x128xf32>
    %12 = arith.divf %11, %10 : vector<1x128xf32>
    %13 = tpu.iota {dimensions = array<i32: 0>} : vector<16x128xi32>
    %14 = arith.sitofp %13 : vector<16x128xi32> to vector<16x128xf32>
    %15 = vector.broadcast %5 : vector<1x128xf32> to vector<16x128xf32>
    %16 = arith.cmpf oeq, %1, %15 : vector<16x128xf32>
    %cst_5 = arith.constant 1.600000e+01 : f32
    %17 = vector.broadcast %cst_5 : f32 to vector<16x128xf32>
    %18 = arith.select %16, %14, %17 : vector<16x128xi1>, vector<16x128xf32>
    %cst_6 = arith.constant dense<0x7F800000> : vector<128xf32>
    %19 = vector.multi_reduction <minimumf>, %18, %cst_6 [0] : vector<16x128xf32> to vector<128xf32>
    %20 = vector.shape_cast %19 : vector<128xf32> to vector<1x128xf32>
    %21 = arith.cmpf oeq, %20, %3 : vector<1x128xf32>
    %22 = arith.extui %21 : vector<1x128xi1> to vector<1x128xi32>
    %23 = arith.sitofp %22 : vector<1x128xi32> to vector<1x128xf32>
    %24 = tpu.iota {dimensions = array<i32: 1>} : vector<1x128xi32>
    %c128_i32 = arith.constant 128 : i32
    %25 = arith.muli %arg0, %c128_i32 : i32
    %26 = vector.broadcast %25 : i32 to vector<1x128xi32>
    %27 = arith.addi %24, %26 : vector<1x128xi32>
    %c64_i32 = arith.constant 64 : i32
    %28 = vector.broadcast %c64_i32 : i32 to vector<1x128xi32>
    %29 = arith.cmpi slt, %27, %28 : vector<1x128xi32>
    %30 = arith.extui %29 : vector<1x128xi1> to vector<1x128xi32>
    %31 = arith.sitofp %30 : vector<1x128xi32> to vector<1x128xf32>
    %cst_7 = arith.constant 0.000000e+00 : f32
    %32 = vector.broadcast %cst_7 : f32 to vector<1x128xf32>
    %33 = arith.select %29, %12, %32 : vector<1x128xi1>, vector<1x128xf32>
    %cst_8 = arith.constant 0.000000e+00 : f32
    %34 = vector.broadcast %cst_8 : f32 to vector<1x128xf32>
    %35 = arith.select %29, %23, %34 : vector<1x128xi1>, vector<1x128xf32>
    %cst_9 = arith.constant 4.000000e+01 : f32
    %36 = vector.broadcast %cst_9 : f32 to vector<1x128xf32>
    %37 = arith.mulf %33, %36 : vector<1x128xf32>
    %38 = math.ceil %37 : vector<1x128xf32>
    %39 = tpu.iota {dimensions = array<i32: 0>} : vector<40x1xi32>
    %40 = arith.sitofp %39 : vector<40x1xi32> to vector<40x1xf32>
    %cst_10 = arith.constant 1.000000e+00 : f32
    %41 = vector.broadcast %cst_10 : f32 to vector<40x1xf32>
    %42 = arith.addf %40, %41 : vector<40x1xf32>
    %43 = vector.broadcast %38 : vector<1x128xf32> to vector<40x128xf32>
    %44 = vector.broadcast %42 : vector<40x1xf32> to vector<40x128xf32>
    %45 = arith.cmpf oeq, %43, %44 : vector<40x128xf32>
    %46 = arith.extui %45 : vector<40x128xi1> to vector<40x128xi32>
    %47 = arith.sitofp %46 : vector<40x128xi32> to vector<40x128xf32>
    %48 = tpu.iota {dimensions = array<i32: 0>} : vector<8x128xi32>
    %c0_i32 = arith.constant 0 : i32
    %49 = vector.broadcast %c0_i32 : i32 to vector<8x128xi32>
    %50 = arith.cmpi eq, %48, %49 : vector<8x128xi32>
    %c1_i32 = arith.constant 1 : i32
    %51 = vector.broadcast %c1_i32 : i32 to vector<8x128xi32>
    %52 = arith.cmpi eq, %48, %51 : vector<8x128xi32>
    %c2_i32 = arith.constant 2 : i32
    %53 = vector.broadcast %c2_i32 : i32 to vector<8x128xi32>
    %54 = arith.cmpi eq, %48, %53 : vector<8x128xi32>
    %cst_11 = arith.constant 0.000000e+00 : f32
    %55 = vector.shape_cast %35 : vector<1x128xf32> to vector<1x128xf32>
    %56 = vector.broadcast %55 : vector<1x128xf32> to vector<8x128xf32>
    %57 = vector.broadcast %cst_11 : f32 to vector<8x128xf32>
    %58 = arith.select %54, %56, %57 : vector<8x128xi1>, vector<8x128xf32>
    %59 = vector.shape_cast %33 : vector<1x128xf32> to vector<1x128xf32>
    %60 = vector.broadcast %59 : vector<1x128xf32> to vector<8x128xf32>
    %61 = arith.select %52, %60, %58 : vector<8x128xi1>, vector<8x128xf32>
    %62 = vector.shape_cast %31 : vector<1x128xf32> to vector<1x128xf32>
    %63 = vector.broadcast %62 : vector<1x128xf32> to vector<8x128xf32>
    %64 = arith.select %50, %63, %61 : vector<8x128xi1>, vector<8x128xf32>
    %cst_12 = arith.constant dense<0.000000e+00> : vector<8x40xf32>
    %65 = tpu.matmul %64, %47, %cst_12 {dimension_numbers = #tpu.dot_dimension_numbers<[1], [1], [0], [0], [0, 0, 1, 0], [], []>, precision = #tpu.contract_precision<fp32>} : vector<8x128xf32>, vector<40x128xf32>, vector<8x40xf32> -> vector<8x40xf32>
    %c0_13 = arith.constant 0 : index
    %c0_14 = arith.constant 0 : index
    %c0_15 = arith.constant 0 : index
    %66 = vector.load %arg3[%c0_13, %c0_14, %c0_15] : memref<1x8x40xf32, #tpu.memory_space<vmem>>, vector<1x8x40xf32>
    %67 = vector.shape_cast %66 : vector<1x8x40xf32> to vector<8x40xf32>
    %68 = vector.shape_cast %65 : vector<8x40xf32> to vector<1x8x40xf32>
    tpu.vector_store %arg3[%c0_13, %c0_14, %c0_15], %68 {strides = array<i32>} : memref<1x8x40xf32, #tpu.memory_space<vmem>>, vector<1x8x40xf32>,
    return
  }
  func.func @transform_0(%arg0: i32) -> (i32, i32) {
    %c0_i32 = arith.constant 0 : i32
    %c0_i32_0 = arith.constant 0 : i32
    return %arg0, %c0_i32 : i32, i32
  }
  func.func @transform_1(%arg0: i32) -> (i32, i32) {
    %c0_i32 = arith.constant 0 : i32
    %c0_i32_0 = arith.constant 0 : i32
    return %c0_i32, %arg0 : i32, i32
  }
  func.func @transform_2(%arg0: i32) -> (i32, i32, i32) {
    %c0_i32 = arith.constant 0 : i32
    %c0_i32_0 = arith.constant 0 : i32
    %c0_i32_1 = arith.constant 0 : i32
    return %arg0, %c0_i32, %c0_i32_0 : i32, i32, i32
  }
}

</mosaic_0001>

<bundles_post_ra>
// kernel: _ece_device.1
= control target key start
LH: loop header
LB: loop body
LE: loop exit
PB: predicated region body
PF: predicated region fallthrough
CT: control target
= control target key end

     0   :  { %v96_v18 = vlaneseq  ;;  %v394_v57 = vmov 0.0   ;;  %s593_s0 = inlined_call_operand.vmem [shape: f32[64,16], index: 0, kind: input, shape index: {}]   ;;  %s594_s1 = inlined_call_operand.vmem [shape: s32[1,64], index: 1, kind: input, shape index: {}]   ;;  %s595_s2 = inlined_call_operand.vmem [shape: f32[1,8,40], index: 2, kind: output, shape index: {}]  }
   0x1   :  { %v11_v0 = vld [vmem:[%s593_s0] sm:$0xff]  ;;  %v12_v1 = vld [vmem:[%s593_s0 + $0x8] sm:$0xff]  ;;  %v13_v2 = vld [vmem:[%s593_s0 + $0x10] sm:$0xff] }
   0x2   :  { %27 = vxpose.xlu0.b32.start [1/16] (narrow) %v11_v0, 16  ;;  %v14_v3 = vld [vmem:[%s593_s0 + $0x18] sm:$0xff]  ;;  %v15_v4 = vld [vmem:[%s593_s0 + $0x20] sm:$0xff]  ;;  %v16_v5 = vld [vmem:[%s593_s0 + $0x28] sm:$0xff]  ;;  %v459_v21 = vshrl.u32 %v96_v18, 7  ;;  %v116_v54 = vand.u32 127, %v96_v18 }
   0x3   :  { %v17_v6 = vld [vmem:[%s593_s0 + $0x30] sm:$0xff]  ;;  %v18_v7 = vld [vmem:[%s593_s0 + $0x38] sm:$0xff]  ;;  %v19_v8 = vld [vmem:[%s593_s0 + $0x40] sm:$0xff] }
   0x4   :  { %v20_v9 = vld [vmem:[%s593_s0 + $0x48] sm:$0xff]  ;;  %v21_v10 = vld [vmem:[%s593_s0 + $0x50] sm:$0xff]  ;;  %v22_v11 = vld [vmem:[%s593_s0 + $0x58] sm:$0xff]  ;;  %v462_v24 = vadd.s32 8, %v459_v21  ;;  %v99_v27 = vcvt.s32.f32 %v459_v21  ;;  %vm120_vm3 = vcmp.lt.s32.totalorder %v116_v54, 64  ;;  %v129_v59 = vadd.s32 32, %v459_v21 }
   0x5   :  { %v23_v12 = vld [vmem:[%s593_s0 + $0x60] sm:$0xff]  ;;  %v24_v13 = vld [vmem:[%s593_s0 + $0x68] sm:$0xff]  ;;  %v25_v14 = vld [vmem:[%s593_s0 + $0x70] sm:$0xff]  ;;  %v128_v60 = vadd.s32 24, %v459_v21  ;;  %v127_v62 = vadd.s32 16, %v459_v21  ;;  %vm155_vm7 = vcmp.eq.s32.totalorder %v459_v21, 2 }
   0x6   :  { %v26_v15 = vld [vmem:[%s593_s0 + $0x78] sm:$0xff]  ;;  %v100_v28 = vcvt.s32.f32 %v462_v24  ;;  %v59_v50 = vld [vmem:[%s594_s1] sm:$0x1]  ;;  %vm154_vm9 = vcmp.eq.s32.totalorder %v459_v21, 1  ;;  %vm153_vm10 = vcmp.eq.s32.totalorder %v459_v21, 0 }
   0x7   :  { %v60_v52 = vcvt.s32.f32 %v59_v50 }
   0xa   :  { %28 = vxpose.xlu0.b32.cont [2/16] (narrow) %v12_v1, 16 }
  0x12   :  { %29 = vxpose.xlu0.b32.cont [3/16] (narrow) %v13_v2, 16 }
  0x1a   :  { %30 = vxpose.xlu0.b32.cont [4/16] (narrow) %v14_v3, 16  ;;  %v132_v3 = vcvt.s32.f32 %v129_v59 }
  0x22   :  { %31 = vxpose.xlu0.b32.cont [5/16] (narrow) %v15_v4, 16  ;;  %v131_v4 = vcvt.s32.f32 %v128_v60 }
  0x2a   :  { %32 = vxpose.xlu0.b32.cont [6/16] (narrow) %v16_v5, 16 }
  0x32   :  { %33 = vxpose.xlu0.b32.cont [7/16] (narrow) %v17_v6, 16  ;;  %v130_v6 = vcvt.s32.f32 %v127_v62 }
  0x3a   :  { %34 = vxpose.xlu0.b32.cont [8/16] (narrow) %v18_v7, 16 }
  0x42   :  { %35 = vxpose.xlu0.b32.cont [9/16] (narrow) %v19_v8, 16 }
  0x4a   :  { %36 = vxpose.xlu0.b32.cont [10/16] (narrow) %v20_v9, 16 }
  0x52   :  { %37 = vxpose.xlu0.b32.cont [11/16] (narrow) %v21_v10, 16 }
  0x5a   :  { %38 = vxpose.xlu0.b32.cont [12/16] (narrow) %v22_v11, 16  ;;  %v480_v11 = vadd.f32 1.0, %v132_v3 }
  0x62   :  { %39 = vxpose.xlu0.b32.cont [13/16] (narrow) %v23_v12, 16 }
  0x6a   :  { %40 = vxpose.xlu0.b32.cont [14/16] (narrow) %v24_v13, 16  ;;  %v483_v13 = vadd.f32 1.0, %v131_v4 }
  0x72   :  { %41 = vxpose.xlu0.b32.cont [15/16] (narrow) %v25_v14, 16  ;;  %v485_v14 = vadd.f32 1.0, %v130_v6 }
  0x7a   :  { %42 = vxpose.xlu0.b32.end [16/16] (narrow) %v26_v15, 16 }
  0xa6   :  { %v43_v16 = vpop.trf.xlu0 }
  0xae   :  { %v44_v17 = vpop.trf.xlu0 }
  0xaf   :  { %v61_v19 = vmax.f32 %v43_v16, %v44_v17 }
  0xb1   :  { %v62_v20 = vrot.slane %v61_v19, 4 }
  0xb3   :  { %v63_v22 = vmax.f32 %v61_v19, %v62_v20  ;;  %v494_v20 = vadd.f32 1.0, %v100_v28 }
  0xb5   :  { %v64_v23 = vrot.slane %v63_v22, 2 }
  0xb7   :  { %v65_v25 = vmax.f32 %v63_v22, %v64_v23  ;;  %v395_v23 = vmov 1.0  }
  0xb9   :  { %v66_v26 = vrot.slane %v65_v25, 1 }
  0xbb   :  { %v67_v29 = vmax.f32 %v65_v25, %v66_v26 }
  0xbd   :  { %v68_v30 = vsub.f32 %v43_v16, %v67_v29  ;;  %v69_v31 = vsub.f32 %v44_v17, %v67_v29  ;;  %vm101_vm0 = vcmp.eq.f32.partialorder %v43_v16, %v67_v29  ;;  %vm102_vm1 = vcmp.eq.f32.partialorder %v44_v17, %v67_v29 }
  0xbe   :  { %v103_v32 = vsel %vm101_vm0, %v99_v27, 16.0  ;;  %v104_v33 = vsel %vm102_vm1, %v100_v28, 16.0  ;;  %v365_v17 = vsel %vm120_vm3, 1.0, %v394_v57  ;;  %v524_v28 = vadd.f32 1.0, %v99_v27 }
  0xbf   :  { %v70_v34 = vmul.f32 1.442695, %v68_v30  ;;  %v72_v35 = vmul.f32 1.442695, %v69_v31  ;;  %v105_v36 = vmin.f32 %v103_v32, %v104_v33  ;;  %vm358_vm0 = vcmask 326656  }
  0xc1   :  { %388 = vpow2.f32 %v70_v34  ;;  %v106_v37 = vrot.slane %v105_v36, 4 }
  0xc2   :  { %390 = vpow2.f32 %v72_v35 }
  0xc3   :  { %v107_v39 = vmin.f32 %v105_v36, %v106_v37 }
  0xc5   :  { %v108_v43 = vrot.slane %v107_v39, 2 }
  0xc7   :  { %v389_v38 = vpop.eup %388  ;;  %v109_v46 = vmin.f32 %v107_v39, %v108_v43 }
  0xc8   :  { %v391_v40 = vpop.eup %390 }
  0xc9   :  { %v74_v41 = vadd.f32 %v391_v40, %v389_v38  ;;  %v110_v49 = vrot.slane %v109_v46, 1 }
  0xcb   :  { %v75_v42 = vrot.slane %v74_v41, 4  ;;  %v111_v53 = vmin.f32 %v109_v46, %v110_v49 }
  0xcd   :  { %v76_v44 = vadd.f32 %v75_v42, %v74_v41  ;;  %vm112_vm2 = vcmp.eq.f32.partialorder %v111_v53, %v60_v52 }
  0xce   :  { %v364_v58 = vsel %vm112_vm2, 1.0, %v394_v57 }
  0xcf   :  { %v77_v45 = vrot.slane %v76_v44, 2  ;;  %v124_v63 = vsel %vm120_vm3, %v364_v58, 0.0 }
  0xd0   :  { %v156_v7 = vperm.slane %v124_v63, 0 }
  0xd1   :  { %v78_v47 = vadd.f32 %v77_v45, %v76_v44 }
  0xd2   :  { %v157_v15 = vsel %vm155_vm7, %v156_v7, 0.0 }
  0xd3   :  { %v79_v48 = vrot.slane %v78_v47, 1 }
  0xd5   :  { %v80_v51 = vadd.f32 %v79_v48, %v78_v47 }
  0xd7   :  { %392 = vrcp.f32 %v80_v51  ;;  %v92_v0 = vand.u32 2147483648, %v80_v51  ;;  %v90_v2 = vand.u32 2147483647, %v80_v51  ;;  %vm86_vm5 = vweird.f32 %v80_v51 }
  0xd9   :  { %v93_v8 = vor.u32 1.1754944e-38, %v92_v0  ;;  %vm91_vm8 = vcmp.eq.f32.partialorder %v90_v2, 8.507059e+37 }
  0xdd   :  { %v393_v55 = vpop.eup %392 }
  0xde   :  { %v82_v56 = vmul.f32 %v393_v55, %v80_v51  ;;  %vm87_vm4 = vweird.f32 %v393_v55 }
  0xdf   :  { %vm88_vm6 = vmor %vm86_vm5, %vm87_vm4 }
  0xe0   :  { %v83_v61 = vsub.f32 1.0, %v82_v56 }
  0xe2   :  { %v84_v1 = vmul.f32 %v393_v55, %v83_v61 }
  0xe4   :  { %v85_v5 = vadd.f32 %v393_v55, %v84_v1 }
  0xe6   :  { %v89_v9 = vsel %vm88_vm6, %v393_v55, %v85_v5 }
  0xe7   :  { %v94_v10 = vsel %vm91_vm8, %v93_v8, %v89_v9 }
  0xe8   :  { %v123_v12 = vsel %vm120_vm3, %v94_v10, 0.0 }
  0xe9   :  { %v125_v16 = vmul.f32 40.0, %v123_v12  ;;  %v158_v18 = vsel %vm154_vm9, %v123_v12, %v157_v15 }
  0xea   :  { %v159_v22 = vsel %vm153_vm10, %v365_v17, %v158_v18 }
  0xeb   :  { %v490_v19 = vceil.f32 %v125_v16  ;;  %v181_v31 = vand.u32 4294901760, %v159_v22 }
  0xed   :  { %vm142_vm11 = vcmp.eq.f32.partialorder %v490_v19, %v480_v11  ;;  %vm141_vm12 = vcmp.eq.f32.partialorder %v490_v19, %v483_v13  ;;  %vm140_vm13 = vcmp.eq.f32.partialorder %v490_v19, %v485_v14  ;;  %vm139_vm14 = vcmp.eq.f32.partialorder %v490_v19, %v494_v20 }
  0xee   :  { %371 = vmatpush.xpose.msk.msra.mxu0 %vm142_vm11, %v395_v23  ;;  %376 = vmatpush.xpose.msk.msra.mxu3 %vm142_vm11, %v395_v23  ;;  %v370_v24 = vsel %vm142_vm11, 1.0, %v394_v57  ;;  %v369_v25 = vsel %vm141_vm12, 1.0, %v394_v57  ;;  %v368_v26 = vsel %vm140_vm13, 1.0, %v394_v57  ;;  %v367_v21 = vsel %vm139_vm14, 1.0, %v394_v57 }
  0xef   :  { %v202_v29 = vsub.f32 %v370_v24, %v370_v24  ;;  %v208_v30 = vsub.f32 %v369_v25, %v369_v25  ;;  %v214_v33 = vsub.f32 %v368_v26, %v368_v26  ;;  %vm138_vm15 = vcmp.eq.f32.partialorder %v490_v19, %v524_v28 }
  0xf0   :  { %v182_v35 = vsub.f32 %v159_v22, %v181_v31  ;;  %v220_v38 = vsub.f32 %v367_v21, %v367_v21  ;;  %v366_v40 = vsel %vm138_vm15, 1.0, %v394_v57 }
  0xf1   :  { %249 = vmatpush.xpose.msra.mxu2 %v202_v29  ;;  %v203_v32 = vand.u32 4294901760, %v202_v29  ;;  %v209_v34 = vand.u32 4294901760, %v208_v30  ;;  %v215_v39 = vand.u32 4294901760, %v214_v33  ;;  %v226_v44 = vsub.f32 %v366_v40, %v366_v40 }
  0xf2   :  { %372 = vmatpush.xpose.msk.msra.mxu0 %vm141_vm12, %v395_v23  ;;  %377 = vmatpush.xpose.msk.msra.mxu3 %vm141_vm12, %v395_v23  ;;  %v183_v41 = vand.u32 4294901760, %v182_v35  ;;  %v221_v45 = vand.u32 4294901760, %v220_v38 }
  0xf3   :  { %v204_v27 = vsub.f32 %v202_v29, %v203_v32  ;;  %v210_v37 = vsub.f32 %v208_v30, %v209_v34  ;;  %v216_v43 = vsub.f32 %v214_v33, %v215_v39  ;;  %v227_v49 = vand.u32 4294901760, %v226_v44 }
  0xf4   :  { %v184_v46 = vsub.f32 %v182_v35, %v183_v41  ;;  %v222_v48 = vsub.f32 %v220_v38, %v221_v45 }
  0xf5   :  { %252 = vmatpush.xpose.msra.mxu2 %v208_v30  ;;  %v205_v36 = vand.u32 4294901760, %v204_v27  ;;  %v211_v42 = vand.u32 4294901760, %v210_v37  ;;  %v217_v47 = vand.u32 4294901760, %v216_v43  ;;  %v228_v52 = vsub.f32 %v226_v44, %v227_v49 }
  0xf6   :  { %373 = vmatpush.xpose.msk.msra.mxu0 %vm140_vm13, %v395_v23  ;;  %378 = vmatpush.xpose.msk.msra.mxu3 %vm140_vm13, %v395_v23  ;;  %v185_v50 = vand.u32 4294901760, %v184_v46  ;;  %v223_v51 = vand.u32 4294901760, %v222_v48 }
  0xf7   :  { %206 = vmatpush.xpose.msra.mxu1 %v205_v36  ;;  %v229_v53 = vand.u32 4294901760, %v228_v52 }
  0xf9   :  { %255 = vmatpush.xpose.msra.mxu2 %v214_v33 }
  0xfa   :  { %374 = vmatpush.xpose.msk.msra.mxu0 %vm139_vm14, %v395_v23  ;;  %379 = vmatpush.xpose.msk.msra.mxu3 %vm139_vm14, %v395_v23 }
  0xfb   :  { %212 = vmatpush.xpose.msra.mxu1 %v211_v42 }
  0xfd   :  { %258 = vmatpush.xpose.msra.mxu2 %v220_v38 }
  0xfe   :  { %375 = vmatpush.xpose.msk.msra.mxu0 %vm138_vm15, %v395_v23  ;;  %380 = vmatpush.xpose.msk.msra.mxu3 %vm138_vm15, %v395_v23 }
  0xff   :  { %218 = vmatpush.xpose.msra.mxu1 %v217_v47 }
 0x101   :  { %186 = vmatmul.f32.vlgmr.msra.gmra.mxu0 %v185_v50  ;;  %261 = vmatpush.xpose.msra.mxu2 %v226_v44 }
 0x102   :  { %310 = vmatpush.xpose.msrb.mxu0 %v203_v32  ;;  %292 = vmatmul.f32.vlgmr.msra.gmra.mxu3 %v183_v41 }
 0x103   :  { %224 = vmatpush.xpose.msra.mxu1 %v223_v51 }
 0x104   :  { %264 = vmatmul.f32.vlgmr.msra.gmra.mxu2 %v182_v35 }
 0x106   :  { %314 = vmatpush.xpose.msrb.mxu0 %v209_v34 }
 0x107   :  { %230 = vmatpush.xpose.msra.mxu1 %v229_v53 }
 0x10a   :  { %318 = vmatpush.xpose.msrb.mxu0 %v215_v39  ;;  %232 = vmatmul.f32.vlgmr.msra.gmra.mxu1 %v181_v31 }
 0x10b   :  { %381 = vmatpush.xpose.msk.msrb.mxu1 %vm142_vm11, %v395_v23 }
 0x10e   :  { %322 = vmatpush.xpose.msrb.mxu0 %v221_v45 }
 0x10f   :  { %382 = vmatpush.xpose.msk.msrb.mxu1 %vm141_vm12, %v395_v23 }
 0x112   :  { %326 = vmatpush.xpose.msrb.mxu0 %v227_v49 }
 0x113   :  { %383 = vmatpush.xpose.msk.msrb.mxu1 %vm140_vm13, %v395_v23 }
 0x115   :  { %328 = vmatmul.f32.vlgmr.msrb.gmra.mxu0 %v181_v31 }
 0x117   :  { %384 = vmatpush.xpose.msk.msrb.mxu1 %vm139_vm14, %v395_v23 }
 0x11b   :  { %385 = vmatpush.xpose.msk.msrb.mxu1 %vm138_vm15, %v395_v23 }
 0x11e   :  { %354 = vmatmul.f32.vlgmr.msrb.gmra.mxu1 %v181_v31 }
 0x17e   :  { %v187_v55 = vpop.f32.mrf.mxu0 }
 0x185   :  { %v293_v59 = vpop.f32.mrf.mxu3 }
 0x187   :  { %v233_v54 = vpop.f32.mrf.mxu1  ;;  %v265_v57 = vpop.f32.mrf.mxu2 }
 0x188   :  { %v234_v56 = vadd.f32 %v233_v54, %v187_v55 }
 0x18a   :  { %v266_v58 = vadd.f32 %v265_v57, %v234_v56 }
 0x18c   :  { %v294_v61 = vadd.f32 %v293_v59, %v266_v58 }
 0x192   :  { %v329_v60 = vpop.f32.mrf.mxu0 }
 0x193   :  { %v330_v62 = vadd.f32 %v329_v60, %v294_v61 }
 0x19b   :  { %v355_v63 = vpop.f32.mrf.mxu1 }
 0x19c   :  { %v356_v0 = vadd.f32 %v355_v63, %v330_v62 }
 0x19e   :  { %359 = vst.msk [vmem:[%s595_s2] sm:$0xff] %vm358_vm0, %v356_v0 }

</bundles_post_ra>
